<compile_context>
chip_gen: v6e
topology: v6e:2x2x1
jax: 0.10.0
libtpu: 0.0.40
codegen_flags: <defaults>
</compile_context>

<pallas_src>
import jax
import jax.numpy as jnp
from jax.experimental import pallas as pl
from jax.experimental.pallas import tpu as pltpu


def _round_up(x, m):
    return ((x + m - 1) // m) * m


def _make_mlp_kernel(num_hidden):
    """num_hidden = number of (Linear + ReLU) layers before the final Linear."""

    def kernel(x_ref, *refs):
        # refs = (W0, b0, ..., W_{H-1}, b_{H-1}, W_last8, out_ref)
        out_ref = refs[-1]
        params = refs[:-1]

        # Elementwise product of the two node embeddings, feature-major.
        # Upcast to f32 so the product is rounded once, then cast to bf16 for
        # the MXU feed (f32 VALU is native on all generations).
        xi = x_ref[0, :, :].astype(jnp.float32)          # (in_c, tile_n)
        xj = x_ref[1, :, :].astype(jnp.float32)
        x = (xi * xj).astype(jnp.bfloat16)               # (in_c, tile_n) bf16

        # Hidden layers: W(out_c,in_c) @ x(in_c,tile_n) on the MXU with f32
        # accumulation; bias add + relu on the f32 accumulator; cast back to
        # bf16 for the next matmul.
        for l in range(num_hidden):
            w = params[2 * l][...]                        # (out_c, in_c)  bf16
            b = params[2 * l + 1][...]                    # (out_c, 1)     f32
            acc = jnp.dot(w, x, preferred_element_type=jnp.float32) + b
            x = jnp.maximum(acc, 0.0).astype(jnp.bfloat16)
            # TODO(synk): F.dropout(training=True) would need pltpu.prng_*;
            # inference mode (training=False) makes dropout an identity.

        # Final layer (out_channels == 1). W_last is zero-padded 1 -> 8 rows so
        # the matmul operand is sublane-aligned; only row 0 is real. The result
        # row (1, tile_n) is lane-dense -> fully unmasked vector stores.
        w_last = params[-1][...]                          # (8, hid_c) bf16
        y = jnp.dot(w_last, x, preferred_element_type=jnp.float32)  # (8, tile_n)
        out_ref[...] = y[0:1, :]                          # b_last added in wrapper

    return kernel


def mlp_predictor_forward(x_i, x_j, weights, biases, *, tile_n=None):
    """Pallas-backed forward pass of MLPPredictor (inference).

    x_i, x_j : (N, in_channels)
    weights  : list of torch-oriented (out_c, in_c) arrays
    biases   : list of (out_c,) arrays
    Returns  : (N, 1) float32.
    """
    num_layers = len(weights)
    N, in_c = x_i.shape
    out_c = weights[-1].shape[0]
    assert out_c == 1, "lane-dense output path assumes out_channels == 1"

    # --- batch tiling --------------------------------------------------------
    # tile_n is a multiple of 128 (lane dim of the feature-major activations).
    # Default 8192 amortizes the ~0.35us/step grid overhead; the cap at
    # ceil(N/2) rounded to 128 keeps >= 2 grid steps when N allows it so v7x's
    # two TensorCores both get work via the "parallel" grid axis.
    if tile_n is None:
        tile_n = min(8192, max(128, _round_up(-(-N // 2), 128)))
    tile_n = max(128, _round_up(tile_n, 128))
    num_tiles = -(-N // tile_n)
    n_pad = num_tiles * tile_n

    # --- dtype / layout prep (done once in the wrapper, not per grid step) ---
    bf16 = jnp.bfloat16
    xi_t = x_i.astype(bf16).T                             # (in_c, N)
    xj_t = x_j.astype(bf16).T
    if n_pad != N:
        # Padded rows produce relu(bias) != 0 after layer 0 and flow through
        # the remaining matmuls; they are sliced off below (wasted work only).
        xi_t = jnp.pad(xi_t, ((0, 0), (0, n_pad - N)))
        xj_t = jnp.pad(xj_t, ((0, 0), (0, n_pad - N)))
    x_stacked = jnp.stack([xi_t, xj_t], axis=0)           # (2, in_c, n_pad)

    const_map = lambda i: (0, 0)
    flat_params, param_specs = [], []
    for l in range(num_layers - 1):                       # hidden layers
        w = weights[l].astype(bf16)                       # (out_c, in_c)
        b = biases[l].reshape(-1, 1).astype(jnp.float32)  # (out_c, 1)
        flat_params += [w, b]
        # Constant index maps -> Pallas DMAs these blocks once and keeps them
        # resident across the whole grid.
        param_specs += [pl.BlockSpec(w.shape, const_map),
                        pl.BlockSpec(b.shape, const_map)]
    # Final layer weight (1, hid_c), zero-padded to 8 rows for sublane alignment.
    k_last = weights[-1].shape[1]
    w_last8 = jnp.zeros((8, k_last), bf16).at[0, :].set(weights[-1][0].astype(bf16))
    flat_params += [w_last8]
    param_specs += [pl.BlockSpec(w_last8.shape, const_map)]

    grid_spec = pltpu.PrefetchScalarGridSpec(
        num_scalar_prefetch=0,
        grid=(num_tiles,),
        in_specs=[
            # single stacked activation stream (halves DMA descriptors/sems)
            pl.BlockSpec((2, in_c, tile_n), lambda i: (0, 0, i)),
        ] + param_specs,
        out_specs=pl.BlockSpec((1, tile_n), lambda i: (0, i)),  # lane-dense row
    )

    # Advisory cost estimate so XLA schedules surrounding ops sensibly.
    dims = [in_c] + [w.shape[0] for w in weights]
    flops = n_pad * in_c + 2 * n_pad * sum(a * b for a, b in zip(dims[:-1], dims[1:]))
    bytes_accessed = (2 * n_pad * in_c * 2                 # bf16 inputs
                      + n_pad * 4                          # f32 output row
                      + sum(int(p.size) * p.dtype.itemsize for p in flat_params))
    cost = pl.CostEstimate(flops=int(flops), transcendentals=0,
                           bytes_accessed=int(bytes_accessed))

    out = pl.pallas_call(
        _make_mlp_kernel(num_layers - 1),
        out_shape=jax.ShapeDtypeStruct((1, n_pad), jnp.float32),
        grid_spec=grid_spec,
        compiler_params=pltpu.CompilerParams(
            dimension_semantics=("parallel",),
            vmem_limit_bytes=32 * 1024 * 1024),
        cost_estimate=cost,
    )(x_stacked, *flat_params)

    # Scalar final bias added here instead of burning a VMEM operand on (1,1).
    row = out[0, :N] + biases[-1].astype(jnp.float32)[0]
    return row.reshape(N, 1)


def _init_params(key, in_channels, hidden_channels, out_channels, num_layers):
    """Deterministic torch.nn.Linear-like init (uniform in +-1/sqrt(fan_in)).

    Weights are stored in torch orientation: (out_c, in_c).
    """
    weights, biases = [], []
    for i in range(num_layers):
        first = in_channels if i == 0 else hidden_channels
        second = out_channels if i == num_layers - 1 else hidden_channels
        key, kw, kb = jax.random.split(key, 3)
        bound = 1.0 / jnp.sqrt(first)
        w = jax.random.uniform(kw, (second, first), jnp.float32, -bound, bound)
        b = jax.random.uniform(kb, (second,), jnp.float32, -bound, bound)
        weights.append(w)
        biases.append(b)
    return weights, biases


def _reference_forward(x_i, x_j, weights, biases):
    """Pure-JAX reference matching the kernel's bf16 MXU feed and f32 math."""
    bf16 = jnp.bfloat16
    xi = x_i.astype(bf16).astype(jnp.float32)
    xj = x_j.astype(bf16).astype(jnp.float32)
    x = (xi * xj).astype(bf16)                            # (N, in_c)
    L = len(weights)
    for l in range(L):
        acc = jnp.dot(x, weights[l].T.astype(bf16),
                      preferred_element_type=jnp.float32) + biases[l]
        if l < L - 1:
            x = jnp.maximum(acc, 0.0).astype(bf16)
        else:
            x = acc
    return x.astype(jnp.float32)


if __name__ == "__main__":
    # Small shapes consistent with the module:
    #   N edges = 8, in_channels = 32, hidden_channels = 64, out_channels = 1,
    #   num_layers = 3, dropout = 0.5 (identity at inference).
    N, IN_C, HID_C, OUT_C, NUM_LAYERS = 8, 32, 64, 1, 3

    key = jax.random.PRNGKey(0)
    k_xi, k_xj, k_params = jax.random.split(key, 3)
    x_i = jax.random.normal(k_xi, (N, IN_C), jnp.float32)
    x_j = jax.random.normal(k_xj, (N, IN_C), jnp.float32)

    weights, biases = _init_params(k_params, IN_C, HID_C, OUT_C, NUM_LAYERS)

    out = mlp_predictor_forward(x_i, x_j, weights, biases)
    out = jax.block_until_ready(out)

    ref = _reference_forward(x_i, x_j, weights, biases)
    assert out.shape == (N, OUT_C), out.shape
    max_err = float(jnp.max(jnp.abs(out - ref)))
    assert jnp.allclose(out, ref, atol=2e-3, rtol=2e-3), (
        f"mismatch vs reference, max err {max_err}")

    print("KERNEL_OK")
</pallas_src>

<mosaic_0001>
module attributes {stable_mosaic.version = 11 : i64} {
  func.func @kernel(%arg0: i32, %arg1: memref<2x32x128xbf16, #tpu.memory_space<vmem>>, %arg2: memref<64x32xbf16, #tpu.memory_space<vmem>>, %arg3: memref<64x1xf32, #tpu.memory_space<vmem>>, %arg4: memref<64x64xbf16, #tpu.memory_space<vmem>>, %arg5: memref<64x1xf32, #tpu.memory_space<vmem>>, %arg6: memref<8x64xbf16, #tpu.memory_space<vmem>>, %arg7: memref<1x128xf32, #tpu.memory_space<vmem>>) attributes {dimension_semantics = [#tpu.dimension_semantics<parallel>], iteration_bounds = array<i64: 1>, scalar_prefetch = 0 : i64, scratch_operands = 0 : i64, tpu.core_type = #tpu.core_type<tc>, window_params = [{transform_indices = @transform_0, window_bounds = array<i64: 2, 32, 128>}, {pipeline_mode = #tpu.pipeline_mode<synchronous>, transform_indices = @transform_1, window_bounds = array<i64: 64, 32>}, {pipeline_mode = #tpu.pipeline_mode<synchronous>, transform_indices = @transform_2, window_bounds = array<i64: 64, 1>}, {pipeline_mode = #tpu.pipeline_mode<synchronous>, transform_indices = @transform_3, window_bounds = array<i64: 64, 64>}, {pipeline_mode = #tpu.pipeline_mode<synchronous>, transform_indices = @transform_4, window_bounds = array<i64: 64, 1>}, {pipeline_mode = #tpu.pipeline_mode<synchronous>, transform_indices = @transform_5, window_bounds = array<i64: 8, 64>}, {transform_indices = @transform_6, window_bounds = array<i64: 1, 128>}]} {
    %c0 = arith.constant 0 : index
    %c0_0 = arith.constant 0 : index
    %c0_1 = arith.constant 0 : index
    %0 = vector.load %arg1[%c0, %c0_0, %c0_1] : memref<2x32x128xbf16, #tpu.memory_space<vmem>>, vector<1x32x128xbf16>
    %1 = vector.shape_cast %0 : vector<1x32x128xbf16> to vector<32x128xbf16>
    %2 = arith.extf %1 : vector<32x128xbf16> to vector<32x128xf32>
    %c1 = arith.constant 1 : index
    %c0_2 = arith.constant 0 : index
    %c0_3 = arith.constant 0 : index
    %3 = vector.load %arg1[%c1, %c0_2, %c0_3] : memref<2x32x128xbf16, #tpu.memory_space<vmem>>, vector<1x32x128xbf16>
    %4 = vector.shape_cast %3 : vector<1x32x128xbf16> to vector<32x128xbf16>
    %5 = arith.extf %4 : vector<32x128xbf16> to vector<32x128xf32>
    %6 = arith.mulf %2, %5 : vector<32x128xf32>
    %7 = arith.truncf %6 : vector<32x128xf32> to vector<32x128xbf16>
    %c0_4 = arith.constant 0 : index
    %c0_5 = arith.constant 0 : index
    %8 = vector.load %arg2[%c0_4, %c0_5] : memref<64x32xbf16, #tpu.memory_space<vmem>>, vector<64x32xbf16>
    %c0_6 = arith.constant 0 : index
    %c0_7 = arith.constant 0 : index
    %9 = vector.load %arg3[%c0_6, %c0_7] : memref<64x1xf32, #tpu.memory_space<vmem>>, vector<64x1xf32>
    %cst = arith.constant dense<0.000000e+00> : vector<64x128xf32>
    %10 = tpu.matmul %8, %7, %cst {dimension_numbers = #tpu.dot_dimension_numbers<[1], [0], [0], [1], [0, 0, 1, 1], [], []>} : vector<64x32xbf16>, vector<32x128xbf16>, vector<64x128xf32> -> vector<64x128xf32>
    %11 = vector.broadcast %9 : vector<64x1xf32> to vector<64x128xf32>
    %12 = arith.addf %10, %11 : vector<64x128xf32>
    %cst_8 = arith.constant 0.000000e+00 : f32
    %13 = vector.broadcast %cst_8 : f32 to vector<64x128xf32>
    %14 = arith.maximumf %12, %13 : vector<64x128xf32>
    %15 = arith.truncf %14 : vector<64x128xf32> to vector<64x128xbf16>
    %c0_9 = arith.constant 0 : index
    %c0_10 = arith.constant 0 : index
    %16 = vector.load %arg4[%c0_9, %c0_10] : memref<64x64xbf16, #tpu.memory_space<vmem>>, vector<64x64xbf16>
    %c0_11 = arith.constant 0 : index
    %c0_12 = arith.constant 0 : index
    %17 = vector.load %arg5[%c0_11, %c0_12] : memref<64x1xf32, #tpu.memory_space<vmem>>, vector<64x1xf32>
    %cst_13 = arith.constant dense<0.000000e+00> : vector<64x128xf32>
    %18 = tpu.matmul %16, %15, %cst_13 {dimension_numbers = #tpu.dot_dimension_numbers<[1], [0], [0], [1], [0, 0, 1, 1], [], []>} : vector<64x64xbf16>, vector<64x128xbf16>, vector<64x128xf32> -> vector<64x128xf32>
    %19 = vector.broadcast %17 : vector<64x1xf32> to vector<64x128xf32>
    %20 = arith.addf %18, %19 : vector<64x128xf32>
    %cst_14 = arith.constant 0.000000e+00 : f32
    %21 = vector.broadcast %cst_14 : f32 to vector<64x128xf32>
    %22 = arith.maximumf %20, %21 : vector<64x128xf32>
    %23 = arith.truncf %22 : vector<64x128xf32> to vector<64x128xbf16>
    %c0_15 = arith.constant 0 : index
    %c0_16 = arith.constant 0 : index
    %24 = vector.load %arg6[%c0_15, %c0_16] : memref<8x64xbf16, #tpu.memory_space<vmem>>, vector<8x64xbf16>
    %cst_17 = arith.constant dense<0.000000e+00> : vector<8x128xf32>
    %25 = tpu.matmul %24, %23, %cst_17 {dimension_numbers = #tpu.dot_dimension_numbers<[1], [0], [0], [1], [0, 0, 1, 1], [], []>} : vector<8x64xbf16>, vector<64x128xbf16>, vector<8x128xf32> -> vector<8x128xf32>
    %26 = vector.extract_strided_slice %25 {offsets = [0, 0], sizes = [1, 128], strides = [1, 1]} : vector<8x128xf32> to vector<1x128xf32>
    %c0_18 = arith.constant 0 : index
    %c0_19 = arith.constant 0 : index
    %27 = vector.load %arg7[%c0_18, %c0_19] : memref<1x128xf32, #tpu.memory_space<vmem>>, vector<1x128xf32>
    tpu.vector_store %arg7[%c0_18, %c0_19], %26 {strides = array<i32>} : memref<1x128xf32, #tpu.memory_space<vmem>>, vector<1x128xf32>,
    return
  }
  func.func @transform_0(%arg0: i32) -> (i32, i32, i32) {
    %c0_i32 = arith.constant 0 : i32
    %c0_i32_0 = arith.constant 0 : i32
    %c0_i32_1 = arith.constant 0 : i32
    return %c0_i32, %c0_i32_0, %arg0 : i32, i32, i32
  }
  func.func @transform_1(%arg0: i32) -> (i32, i32) {
    %c0_i32 = arith.constant 0 : i32
    %c0_i32_0 = arith.constant 0 : i32
    %c0_i32_1 = arith.constant 0 : i32
    return %c0_i32, %c0_i32_0 : i32, i32
  }
  func.func @transform_2(%arg0: i32) -> (i32, i32) {
    %c0_i32 = arith.constant 0 : i32
    %c0_i32_0 = arith.constant 0 : i32
    %c0_i32_1 = arith.constant 0 : i32
    return %c0_i32, %c0_i32_0 : i32, i32
  }
  func.func @transform_3(%arg0: i32) -> (i32, i32) {
    %c0_i32 = arith.constant 0 : i32
    %c0_i32_0 = arith.constant 0 : i32
    %c0_i32_1 = arith.constant 0 : i32
    return %c0_i32, %c0_i32_0 : i32, i32
  }
  func.func @transform_4(%arg0: i32) -> (i32, i32) {
    %c0_i32 = arith.constant 0 : i32
    %c0_i32_0 = arith.constant 0 : i32
    %c0_i32_1 = arith.constant 0 : i32
    return %c0_i32, %c0_i32_0 : i32, i32
  }
  func.func @transform_5(%arg0: i32) -> (i32, i32) {
    %c0_i32 = arith.constant 0 : i32
    %c0_i32_0 = arith.constant 0 : i32
    %c0_i32_1 = arith.constant 0 : i32
    return %c0_i32, %c0_i32_0 : i32, i32
  }
  func.func @transform_6(%arg0: i32) -> (i32, i32) {
    %c0_i32 = arith.constant 0 : i32
    %c0_i32_0 = arith.constant 0 : i32
    return %c0_i32, %arg0 : i32, i32
  }
}

</mosaic_0001>

<bundles_post_ra>
// kernel: tpu_custom_call.1
= control target key start
LH: loop header
LB: loop body
LE: loop exit
PB: predicated region body
PF: predicated region fallthrough
CT: control target
= control target key end

     0   :  { %vm124_vm0 = vcmask 261120   ;;  %v574_v8 = vmov 0   ;;  %s712_s0 = inlined_call_operand.vmem [shape: bf16[2,32,128], index: 0, kind: input, shape index: {}]   ;;  %s713_s1 = inlined_call_operand.vmem [shape: bf16[64,32], index: 1, kind: input, shape index: {}]   ;;  %s714_s2 = inlined_call_operand.vmem [shape: f32[64,1], index: 2, kind: input, shape index: {}]   ;;  %s715_s3 = inlined_call_operand.vmem [shape: bf16[64,64], index: 3, kind: input, shape index: {}]   ;;  %s716_s4 = inlined_call_operand.vmem [shape: f32[64,1], index: 4, kind: input, shape index: {}]   ;;  %s717_s5 = inlined_call_operand.vmem [shape: bf16[8,64], index: 5, kind: input, shape index: {}]   ;;  %s718_s6 = inlined_call_operand.hbm [shape: f32[1,128], index: 6, kind: output, shape index: {}]  }
   0x1   :  { %v476_v0 = vld [vmem:[%s712_s0 + $0x8] sm:$0xff]   ;;  %v478_v1 = vld [vmem:[%s712_s0 + $0x18] sm:$0xff]   ;;  %v461_v2 = vld [vmem:[%s712_s0] sm:$0xff]   ;;  %542 = vset.pattern.permute.xlu0 %v574_v8  ;;  %543 = vset.pattern.permute.xlu1 %v574_v8 }
   0x2   :  { %v466_v3 = vunpack.c.l.bf16 %v476_v0  ;;  %v467_v4 = vunpack.c.h.bf16 %v476_v0  ;;  %v474_v5 = vunpack.c.l.bf16 %v478_v1  ;;  %v475_v6 = vunpack.c.h.bf16 %v478_v1  ;;  %v477_v7 = vld [vmem:[%s712_s0 + $0x10] sm:$0xff]   ;;  %v544_v13 = vld [vmem:[%s713_s1] sm:$0xff]   ;;  %v63_v22 = vld [vmem:[%s714_s2 + $0x38] sm:$0xff] }
   0x3   :  { %v462_v9 = vunpack.c.l.bf16 %v461_v2  ;;  %v463_v10 = vunpack.c.h.bf16 %v461_v2  ;;  %v470_v11 = vunpack.c.l.bf16 %v477_v7  ;;  %v471_v12 = vunpack.c.h.bf16 %v477_v7  ;;  %502 = vmatprep.mubr.msk.bf16.mxu0 %vm124_vm0, %v544_v13  ;;  %v62_v19 = vld [vmem:[%s714_s2 + $0x30] sm:$0xff]  ;;  %v60_v21 = vld [vmem:[%s714_s2 + $0x20] sm:$0xff]  ;;  %v61_v23 = vld [vmem:[%s714_s2 + $0x28] sm:$0xff] }
   0x4   :  { %v44_v14 = vmul.f32 %v474_v5, %v466_v3  ;;  %v45_v15 = vmul.f32 %v475_v6, %v467_v4  ;;  %96 = vperm.xlu0 %542, %v62_v19   ;;  %86 = vperm.xlu1 %543, %v60_v21   ;;  %v545_v24 = vld [vmem:[%s713_s1 + $0x8] sm:$0xff]   ;;  %v546_v25 = vld [vmem:[%s713_s1 + $0x10] sm:$0xff]   ;;  %v59_v27 = vld [vmem:[%s714_s2 + $0x18] sm:$0xff] }
   0x5   :  { %v42_v16 = vmul.f32 %v470_v11, %v462_v9  ;;  %v43_v17 = vmul.f32 %v471_v12, %v463_v10  ;;  %v58_v26 = vld [vmem:[%s714_s2 + $0x10] sm:$0xff] }
   0x6   :  { %v47_v18 = vpack.c.bf16 %v45_v15, %v44_v14 }
   0x7   :  { %v46_v20 = vpack.c.bf16 %v43_v17, %v42_v16 }
   0x8   :  { %498 = vmatprep.subr.bf16.mxu0 %v47_v18  ;;  %101 = vperm.xlu0 %542, %v63_v22  }
   0x9   :  { %499 = vmatpush3.bf16.msra.mxu0 %v47_v18  ;;  %91 = vperm.xlu1 %543, %v61_v23  }
   0xa   :  { %500 = vmatprep.subr.bf16.mxu0 %v46_v20 }
   0xd   :  { %501 = vmatpush3.bf16.msra.mxu0 %v46_v20 }
   0xe   :  { %11 = vsyncpa [#allocation3], 0  ;;  %76 = vperm.xlu0 %542, %v58_v26   ;;  %81 = vperm.xlu1 %543, %v59_v27   ;;  %v56_v28 = vld [vmem:[%s714_s2] sm:$0xff]  ;;  %v57_v29 = vld [vmem:[%s714_s2 + $0x8] sm:$0xff]  ;;  %vm290_vm1 = vcmask 523264   ;;  %v575_v15 = vmov 0.0  }
   0xf   :  { %v547_v30 = vld [vmem:[%s713_s1 + $0x18] sm:$0xff]   ;;  %v228_v31 = vld [vmem:[%s716_s4 + $0x30] sm:$0xff]  ;;  %v226_v33 = vld [vmem:[%s716_s4 + $0x20] sm:$0xff]  ;;  %526 = vmatprep.subr.bf16.mxu0 %v575_v15  ;;  %vm576_vm2 = vmmov 0   ;;  %s577_s25 = smov [#allocation2]  }
  0x10   :  { %503 = vmatmul.mubr.msk.bf16.vlgmr.msra.gmra.mxu0 %vm124_vm0, %v545_v24  ;;  %v229_v32 = vld [vmem:[%s716_s4 + $0x38] sm:$0xff]  ;;  %v227_v34 = vld [vmem:[%s716_s4 + $0x28] sm:$0xff]  ;;  %v224_v35 = vld [vmem:[%s716_s4 + $0x10] sm:$0xff]  ;;  %s431_s26 = sshll.u32 %s577_s25, 4  ;;  %s432_s26 = int_to_ptr.vmem [resolvable:$true] %s431_s26 }
  0x11   :  { %506 = vmatprep.mubr.msk.bf16.mxu0 %vm124_vm0, %v546_v25  ;;  %v225_v36 = vld [vmem:[%s716_s4 + $0x18] sm:$0xff]  ;;  %v222_v37 = vld [vmem:[%s716_s4] sm:$0xff]  ;;  %v223_v38 = vld [vmem:[%s716_s4 + $0x8] sm:$0xff]  ;;  %s552_s27 = scalar_lea.vmem %s432_s26, 16  ;;  %s556_s28 = scalar_lea.vmem %s432_s26, 32 }
  0x12   :  { %66 = vperm.xlu0 %542, %v56_v28   ;;  %71 = vperm.xlu1 %543, %v57_v29   ;;  %v548_v39 = vld [vmem:[%s715_s3] sm:$0xff]   ;;  %v549_v12 = vld [vmem:[%s715_s3 + $0x8] sm:$0xff]   ;;  %v550_v13 = vld [vmem:[%s715_s3 + $0x10] sm:$0xff]   ;;  %p553_p0 = scmp.ne.s32.totalorder %s432_s26, %s552_s27  ;;  %p557_p1 = scmp.lt.s32.totalorder %s432_s26, %s432_s26 }
  0x13   :  { %518 = vmatprep.mubr.msk.bf16.mxu1 %vm290_vm1, %v548_v39  ;;  %v551_v14 = vld [vmem:[%s715_s3 + $0x18] sm:$0xff]   ;;  %p558_p2 = scmp.lt.s32.totalorder %s556_s28, %s552_s27 }
  0x15   :  { %p559_p3 = por %p558_p2, %p557_p1 }
  0x16   :  { %262 = vperm.xlu0 %542, %v228_v31   ;;  %267 = vperm.xlu1 %543, %v229_v32  }
  0x17   :  { %p560_p4 = pnand %p559_p3, %p553_p0 }
  0x18   :  { %507 = vmatmul.mubr.msk.bf16.gmra.mxu0 %vm124_vm0, %v547_v30 }
  0x19   :  { %534 = vmatprep.mubr.msk.bf16.mxu0 %vm576_vm2, %v575_v15 }
  0x1a   :  { %252 = vperm.xlu0 %542, %v226_v33   ;;  %257 = vperm.xlu1 %543, %v227_v34  }
  0x1e   :  { %242 = vperm.xlu0 %542, %v224_v35   ;;  %247 = vperm.xlu1 %543, %v225_v36  }
  0x22   :  { %232 = vperm.xlu0 %542, %v222_v37   ;;  %237 = vperm.xlu1 %543, %v223_v38  }
  0x7f   :  { %v87_v40 = vpop.permute.xlu1 %86  ;;  %v97_v42 = vpop.permute.xlu0 %96 }
  0x83   :  { %v102_v47 = vpop.permute.xlu0 %101 }
  0x84   :  { %v92_v45 = vpop.permute.xlu1 %91 }
  0x89   :  { %v82_v51 = vpop.permute.xlu1 %81  ;;  %v77_v55 = vpop.permute.xlu0 %76 }
  0x8d   :  { %v72_v1 = vpop.permute.xlu1 %71  ;;  %v67_v5 = vpop.permute.xlu0 %66 }
  0x91   :  { %v268_v17 = vpop.permute.xlu1 %267  ;;  %v263_v19 = vpop.permute.xlu0 %262 }
  0x95   :  { %v258_v22 = vpop.permute.xlu1 %257  ;;  %v253_v24 = vpop.permute.xlu0 %252 }
  0x99   :  { %v248_v29 = vpop.permute.xlu1 %247  ;;  %v243_v35 = vpop.permute.xlu0 %242 }
  0xd0   :  { %v504_v41 = vpop.f32.mrf.mxu0 }
  0xd1   :  { %v180_v61 = vadd.f32 %v504_v41, %v77_v55  ;;  %v238_v41 = vpop.permute.xlu1 %237 }
  0xd2   :  { %v171_v43 = vpop.f32.mrf.mxu0 }
  0xd3   :  { %v204_v6 = vmax.f32 %v180_v61, 0.0  ;;  %v172_v7 = vadd.f32 %v171_v43, %v67_v5 }
  0xd4   :  { %v505_v44 = vpop.f32.mrf.mxu0 }
  0xd5   :  { %v183_v57 = vadd.f32 %v505_v44, %v82_v51  ;;  %v202_v10 = vmax.f32 %v172_v7, 0.0 }
  0xd6   :  { %v174_v46 = vpop.f32.mrf.mxu0 }
  0xd7   :  { %v205_v2 = vmax.f32 %v183_v57, 0.0  ;;  %v175_v3 = vadd.f32 %v174_v46, %v72_v1 }
  0xd8   :  { %v508_v48 = vpop.f32.mrf.mxu0 }
  0xd9   :  { %v196_v50 = vadd.f32 %v508_v48, %v97_v42  ;;  %v211_v8 = vpack.c.bf16 %v205_v2, %v204_v6  ;;  %v203_v9 = vmax.f32 %v175_v3, 0.0 }
  0xda   :  { %v187_v49 = vpop.f32.mrf.mxu0 }
  0xdb   :  { %v188_v53 = vadd.f32 %v187_v49, %v87_v40  ;;  %v208_v58 = vmax.f32 %v196_v50, 0.0  ;;  %v210_v11 = vpack.c.bf16 %v203_v9, %v202_v10 }
  0xdc   :  { %v509_v52 = vpop.f32.mrf.mxu0 }
  0xdd   :  { %v199_v54 = vadd.f32 %v509_v52, %v102_v47  ;;  %v206_v62 = vmax.f32 %v188_v53, 0.0  ;;  %v380_v52 = vld [vmem:[%s717_s5] sm:$0xf] }
  0xde   :  { %v190_v56 = vpop.f32.mrf.mxu0 }
  0xdf   :  { %v209_v59 = vmax.f32 %v199_v54, 0.0  ;;  %v191_v60 = vadd.f32 %v190_v56, %v92_v45  ;;  %v233_v45 = vpop.permute.xlu0 %232 }
  0xe1   :  { %v207_v63 = vmax.f32 %v191_v60, 0.0  ;;  %v213_v0 = vpack.c.bf16 %v209_v59, %v208_v58 }
  0xe3   :  { %v212_v4 = vpack.c.bf16 %v207_v63, %v206_v62  ;;  %510 = vmatprep.subr.bf16.mxu1 %v213_v0 }
  0xe4   :  { %511 = vmatpush3.bf16.msra.mxu1 %v213_v0 }
  0xe5   :  { %512 = vmatprep.subr.bf16.mxu1 %v212_v4 }
  0xe8   :  { %513 = vmatpush3.bf16.msra.mxu1 %v212_v4 }
  0xe9   :  { %514 = vmatprep.subr.bf16.mxu1 %v211_v8 }
  0xec   :  { %515 = vmatpush3.bf16.msra.mxu1 %v211_v8 }
  0xed   :  { %516 = vmatprep.subr.bf16.mxu1 %v210_v11 }
  0xf0   :  { %517 = vmatpush3.bf16.msra.mxu1 %v210_v11 }
  0xf3   :  { %519 = vmatmul.mubr.msk.bf16.vlgmr.msra.gmra.mxu1 %vm290_vm1, %v549_v12 }
  0xf4   :  { %522 = vmatprep.mubr.msk.bf16.mxu1 %vm290_vm1, %v550_v13 }
  0xfb   :  { %523 = vmatmul.mubr.msk.bf16.gmra.mxu1 %vm290_vm1, %v551_v14 }
 0x1b3   :  { %v520_v16 = vpop.f32.mrf.mxu1 }
 0x1b4   :  { %v346_v39 = vadd.f32 %v520_v16, %v243_v35 }
 0x1b5   :  { %v337_v18 = vpop.f32.mrf.mxu1 }
 0x1b6   :  { %v370_v46 = vmax.f32 %v346_v39, 0.0  ;;  %v338_v47 = vadd.f32 %v337_v18, %v233_v45 }
 0x1b7   :  { %v521_v20 = vpop.f32.mrf.mxu1 }
 0x1b8   :  { %v349_v36 = vadd.f32 %v521_v20, %v248_v29  ;;  %v368_v50 = vmax.f32 %v338_v47, 0.0 }
 0x1b9   :  { %v340_v21 = vpop.f32.mrf.mxu1 }
 0x1ba   :  { %v371_v42 = vmax.f32 %v349_v36, 0.0  ;;  %v341_v43 = vadd.f32 %v340_v21, %v238_v41 }
 0x1bb   :  { %v524_v23 = vpop.f32.mrf.mxu1 }
 0x1bc   :  { %v362_v26 = vadd.f32 %v524_v23, %v263_v19  ;;  %v377_v48 = vpack.c.bf16 %v371_v42, %v370_v46  ;;  %v369_v49 = vmax.f32 %v341_v43, 0.0 }
 0x1bd   :  { %v353_v25 = vpop.f32.mrf.mxu1 }
 0x1be   :  { %v374_v31 = vmax.f32 %v362_v26, 0.0  ;;  %v354_v32 = vadd.f32 %v353_v25, %v253_v24  ;;  %v376_v51 = vpack.c.bf16 %v369_v49, %v368_v50 }
 0x1bf   :  { %v525_v27 = vpop.f32.mrf.mxu1 }
 0x1c0   :  { %v365_v28 = vadd.f32 %v525_v27, %v268_v17  ;;  %v372_v40 = vmax.f32 %v354_v32, 0.0 }
 0x1c1   :  { %v356_v30 = vpop.f32.mrf.mxu1 }
 0x1c2   :  { %v375_v33 = vmax.f32 %v365_v28, 0.0  ;;  %v357_v34 = vadd.f32 %v356_v30, %v258_v22 }
 0x1c4   :  { %v379_v37 = vpack.c.bf16 %v375_v33, %v374_v31  ;;  %v373_v38 = vmax.f32 %v357_v34, 0.0 }
 0x1c6   :  { %527 = vmatpush3.bf16.msra.mxu0 %v379_v37  ;;  %v378_v44 = vpack.c.bf16 %v373_v38, %v372_v40 }
 0x1c7   :  { %528 = vmatprep.subr.bf16.mxu0 %v575_v15 }
 0x1ca   :  { %529 = vmatpush3.bf16.msra.mxu0 %v378_v44 }
 0x1cb   :  { %530 = vmatprep.subr.bf16.mxu0 %v575_v15 }
 0x1ce   :  { %531 = vmatpush3.bf16.msra.mxu0 %v377_v48 }
 0x1cf   :  { %532 = vmatprep.subr.bf16.mxu0 %v575_v15 }
 0x1d2   :  { %533 = vmatpush3.bf16.msra.mxu0 %v376_v51 }
 0x1d5   :  { %535 = vmatmul.mubr.msk.bf16.vlgmr.msra.gmra.mxu0 %vm290_vm1, %v380_v52 }
 0x295   :  { %v418_v53 = vpop.f32.mrf.mxu0 }
 0x296   :  { %424 = vst [vmem:[#allocation2] sm:$0x1] %v418_v53 }
 0x297   :  { %v536_v54 = vpop.f32.mrf.mxu0 }
 0x298   :  { %563 = shalt.err (!%p560_p4)
}
 0x299   :  { %434 = dma.vmem_to_hbm [thread:$0]  %s432_s26, 16, %s718_s6, [#allocation3]   ;;  %v421_v55 = vpop.f32.mrf.mxu0 }
 0x29b   :  { %v537_v56 = vpop.f32.mrf.mxu0 }
 0x29c   :  { %572 = dma.done.wait [#allocation3], 16  }
 0x29d   :  { %573 = vsyncadd [#allocation3], 4294967280 }
 0x29e   :  { %438 = vsyncpa [#allocation3], 1 }

</bundles_post_ra>
